<compile_context>
chip_gen: v6e
topology: v6e:2x2x1
jax: 0.10.0
libtpu: 0.0.40
codegen_flags: <defaults>
</compile_context>

<pallas_src>
import functools

import jax
import jax.numpy as jnp
from jax import lax
from jax.experimental import pallas as pl
from jax.experimental.pallas import tpu as pltpu

EPS = 1e-12


@functools.cache
def _vmem_capacity_bytes():
    try:
        return int(pltpu.get_tpu_info().vmem_capacity_bytes)
    except Exception:
        return 64 << 20  # conservative (v7x-sized) fallback


@functools.cache
def _buffered_supported():
    """One-time cached probe: does this build accept (and correctly run)
    pipeline_mode=pl.Buffered(1) on a grid-invariant operand?"""
    if not hasattr(pl, "Buffered"):
        return False
    try:
        def k(a_ref, c_ref, o_ref):
            o_ref[...] = a_ref[...] + c_ref[...]

        f = pl.pallas_call(
            k,
            out_shape=jax.ShapeDtypeStruct((16, 128), jnp.float32),
            grid_spec=pltpu.PrefetchScalarGridSpec(
                num_scalar_prefetch=0,
                grid=(2,),
                in_specs=[
                    pl.BlockSpec((8, 128), lambda i: (i, 0)),
                    pl.BlockSpec((8, 128), lambda i: (0, 0),
                                 pipeline_mode=pl.Buffered(1)),
                ],
                out_specs=pl.BlockSpec((8, 128), lambda i: (i, 0)),
            ),
        )
        a = jnp.arange(16 * 128, dtype=jnp.float32).reshape(16, 128)
        c = jnp.ones((8, 128), jnp.float32)
        got = jax.block_until_ready(f(a, c))
        return bool(jnp.allclose(got, a + 1.0))
    except Exception:
        return False


def _make_kernel(ncol):
    """ncol == 1: fully fused LN + Linear + residual.
    ncol  > 1: LayerNorm hoisted to a VMEM scratch (computed once per row tile
    at j == 0, stored in the MXU dtype) and reused for every column block."""
    if ncol == 1:
        def kernel(x_ref, w_ref, b_ref, gamma_ref, beta_ref, out_ref):
            # x_ref: (tm, H)  w_ref: (H, H)  b_ref/gamma/beta: (1, H)
            x = x_ref[...].astype(jnp.float32)
            u = jnp.mean(x, axis=-1, keepdims=True)
            xc = x - u
            s = jnp.mean(xc * xc, axis=-1, keepdims=True)
            y = gamma_ref[...] * (xc * lax.rsqrt(s + EPS)) + beta_ref[...]
            z = jnp.dot(y.astype(w_ref.dtype), w_ref[...],
                        preferred_element_type=jnp.float32) + b_ref[...]
            # Residual: re-read the VMEM-resident x tile *after* the dot so the
            # f32 copy of x does not stay live across the MXU call.
            out_ref[...] = (x_ref[...].astype(jnp.float32) + z).astype(out_ref.dtype)
        return kernel

    def kernel(x_ref, w_ref, b_ref, gamma_ref, beta_ref, out_ref, y_scr):
        # x_ref: (tm, H)  w_ref: (H, tn)  b_ref: (1, tn)  out_ref: (tm, tn)
        j = pl.program_id(1)

        @pl.when(j == 0)
        def _():
            x = x_ref[...].astype(jnp.float32)
            u = jnp.mean(x, axis=-1, keepdims=True)
            xc = x - u
            s = jnp.mean(xc * xc, axis=-1, keepdims=True)
            y = gamma_ref[...] * (xc * lax.rsqrt(s + EPS)) + beta_ref[...]
            y_scr[...] = y.astype(y_scr.dtype)       # already in the MXU dtype

        z = jnp.dot(y_scr[...], w_ref[...],
                    preferred_element_type=jnp.float32) + b_ref[...]
        tn = out_ref.shape[-1]
        col = pl.multiple_of(j * tn, tn)
        x_res = x_ref[:, pl.ds(col, tn)].astype(jnp.float32)
        out_ref[...] = (x_res + z).astype(out_ref.dtype)
    return kernel


def sublayer_connection(x, w, b, gamma, beta, *, tm=None, tn=None,
                        mxu_dtype=jnp.bfloat16):
    """x: (B, S, H); w: (H, H); b, gamma, beta: (H,).
    mxu_dtype: dtype fed to the MXU (bf16 fast path by default, f32 accumulate);
    pass None to keep the weight's native dtype."""
    B, S, H = x.shape
    rows = B * S

    vmem_cap = _vmem_capacity_bytes()
    big_vmem = vmem_cap >= (96 << 20)      # v5e / v6e (128 MiB); v7x has 64 MiB
    buffered_ok = _buffered_supported()

    # --- bf16 MXU fast path (f32 accumulation is kept in the kernel) ---
    w_mxu = w
    if (mxu_dtype is not None and
            jnp.dtype(w.dtype).itemsize > jnp.dtype(mxu_dtype).itemsize):
        w_mxu = w.astype(mxu_dtype)
    x_item = jnp.dtype(x.dtype).itemsize
    w_item = jnp.dtype(w_mxu.dtype).itemsize

    # --- row tile: large on v5e/v6e (HBM-bound regime), smaller on v7x (64 MiB VMEM)
    if tm is None:
        if big_vmem:
            tm = 1024 if H <= 1024 else (512 if H <= 2048 else 256)
        else:
            tm = 256 if H <= 2048 else 128
    sub = 8 if x_item == 4 else 16                 # sublane packing
    align = 128 if rows >= 128 else sub            # keep MXU rows / vst full-width
    tm = min(tm, rows)
    tm = max(align, (tm // align) * align)

    # --- column tile: only when the full (H, H) weight does not fit VMEM
    # single-buffered.  With ncol == 1 the weight is grid-invariant and is
    # DMA'd from HBM exactly once for the whole kernel (biggest HBM lever).
    w_budget = (20 << 20) if big_vmem else (10 << 20)
    if tn is None:
        if H * H * w_item <= w_budget:
            tn = H
        elif H % 512 == 0:
            tn = 512
        elif H % 256 == 0:
            tn = 256
        else:
            tn = H
    if H % tn != 0 or (tn != H and tn % 128 != 0):
        tn = H
    ncol = H // tn

    xf = x.reshape(rows, H)
    b2 = b.reshape(1, H).astype(jnp.float32)
    g2 = gamma.reshape(1, H).astype(jnp.float32)
    be2 = beta.reshape(1, H).astype(jnp.float32)

    # --- VMEM budget: pipelined x/out tiles + weight block + f32 temporaries.
    w_bufs = 1 if (ncol == 1 and buffered_ok) else 2
    est = (2 * tm * H * x_item                     # x row tile (double-buffered)
           + 2 * tm * tn * x_item                  # out tile (double-buffered)
           + w_bufs * H * tn * w_item              # sublayer weight block
           + 4 * tm * H * 4                        # f32 intermediates (x, xc, xn, y)
           + (tm * H * w_item if ncol > 1 else 0)  # hoisted-LN scratch
           + 4 * (3 * H + tn) * 4)                 # bias / LN params
    vmem_limit = int(min(max(est * 5 // 4 + (2 << 20), 16 << 20),
                         (vmem_cap * 11) // 20))   # <= ~55% of physical VMEM

    def inv(shape, index_map):
        # Grid-invariant operand: single-buffer it when the build supports it.
        if buffered_ok:
            return pl.BlockSpec(shape, index_map, pipeline_mode=pl.Buffered(1))
        return pl.BlockSpec(shape, index_map)

    # w / b are grid-invariant only when the column axis is untiled.
    wspec = inv if ncol == 1 else pl.BlockSpec

    grid_spec = pltpu.PrefetchScalarGridSpec(
        num_scalar_prefetch=0,
        # Ragged row counts: the last row tile is a partial edge block; its
        # out-of-bounds input rows hold unspecified values, but every output
        # row depends only on its own input row and OOB writes are discarded.
        grid=(pl.cdiv(rows, tm), ncol),
        in_specs=[
            pl.BlockSpec((tm, H), lambda i, j: (i, 0)),   # x row tile
            wspec((H, tn), lambda i, j: (0, j)),          # sublayer weight block
            wspec((1, tn), lambda i, j: (0, j)),          # sublayer bias
            inv((1, H), lambda i, j: (0, 0)),             # LayerNorm weight
            inv((1, H), lambda i, j: (0, 0)),             # LayerNorm bias
        ],
        out_specs=pl.BlockSpec((tm, tn), lambda i, j: (i, j)),
        scratch_shapes=([pltpu.VMEM((tm, H), w_mxu.dtype)] if ncol > 1 else []),
    )

    cost = pl.CostEstimate(
        flops=2 * rows * H * H + 10 * rows * H,
        transcendentals=rows,                      # one rsqrt per row
        bytes_accessed=2 * rows * H * x_item + H * H * w_item + 16 * H,
    )

    out = pl.pallas_call(
        _make_kernel(ncol),
        out_shape=jax.ShapeDtypeStruct((rows, H), x.dtype),
        grid_spec=grid_spec,
        compiler_params=pltpu.CompilerParams(
            # Rows shard across TensorCores; the column axis stays "arbitrary"
            # so the (tm, H) x tile remains resident across j.
            dimension_semantics=("parallel", "arbitrary"),
            vmem_limit_bytes=vmem_limit,
        ),
        cost_estimate=cost,
        # Untiled case: output has exactly the input's shape/dtype; aliasing
        # removes the extra (rows, H) HBM output allocation.
        input_output_aliases=({0: 0} if ncol == 1 else {}),
    )(xf, w_mxu, b2, g2, be2)

    return out.reshape(B, S, H)


def reference(x, w, b, gamma, beta, mxu_dtype=None):
    xf = x.astype(jnp.float32)
    u = jnp.mean(xf, axis=-1, keepdims=True)
    s = jnp.mean((xf - u) ** 2, axis=-1, keepdims=True)
    xn = (xf - u) / jnp.sqrt(s + EPS)
    y = gamma.astype(jnp.float32) * xn + beta.astype(jnp.float32)
    wm = w.astype(jnp.float32)
    if mxu_dtype is not None:
        y = y.astype(mxu_dtype)
        wm = w.astype(mxu_dtype)
    z = jnp.einsum("bsh,hk->bsk", y, wm,
                   preferred_element_type=jnp.float32) + b.astype(jnp.float32)
    return (xf + z).astype(x.dtype)


if __name__ == "__main__":
    B, S, H = 2, 8, 32
    key = jax.random.PRNGKey(0)
    kx, kw, kb, kx2 = jax.random.split(key, 4)

    x = jax.random.normal(kx, (B, S, H), dtype=jnp.float32)
    gamma = jnp.ones((H,), dtype=jnp.float32)      # LayerNorm.weight
    beta = jnp.zeros((H,), dtype=jnp.float32)      # LayerNorm.bias
    w = jax.random.normal(kw, (H, H), dtype=jnp.float32) * (1.0 / jnp.sqrt(H))
    b = jax.random.normal(kb, (H,), dtype=jnp.float32) * 0.01

    # 1) exact-precision path (native-dtype MXU) vs f32 reference; tm=8 gives a
    #    real multi-step row grid at this toy size.
    ref = reference(x, w, b, gamma, beta)
    out = jax.block_until_ready(
        sublayer_connection(x, w, b, gamma, beta, tm=8, mxu_dtype=None))
    assert out.shape == (B, S, H)
    assert jnp.allclose(out, ref, atol=1e-4, rtol=1e-4), "mismatch (f32 path)"

    # 2) default bf16 MXU fast path + ragged row count (B*S not divisible by
    #    the row tile -> exercises the in-kernel partial edge block, no padding).
    x2 = jax.random.normal(kx2, (2, 7, H), dtype=jnp.float32)
    ref2 = reference(x2, w, b, gamma, beta, mxu_dtype=jnp.bfloat16)
    out2 = jax.block_until_ready(
        sublayer_connection(x2, w, b, gamma, beta, tm=8))
    assert out2.shape == (2, 7, H)
    assert jnp.allclose(out2, ref2, atol=3e-2, rtol=3e-2), "mismatch (bf16 path)"

    # 3) forced column tiling (tn < H) -> exercises the hoisted-LN scratch path.
    H3 = 256
    kw3, kb3, kx3 = jax.random.split(kw, 3)
    x3 = jax.random.normal(kx3, (2, 8, H3), dtype=jnp.float32)
    gamma3 = jnp.ones((H3,), dtype=jnp.float32)
    beta3 = jnp.zeros((H3,), dtype=jnp.float32)
    w3 = jax.random.normal(kw3, (H3, H3), dtype=jnp.float32) * (1.0 / jnp.sqrt(H3))
    b3 = jax.random.normal(kb3, (H3,), dtype=jnp.float32) * 0.01
    ref3 = reference(x3, w3, b3, gamma3, beta3, mxu_dtype=jnp.bfloat16)
    out3 = jax.block_until_ready(
        sublayer_connection(x3, w3, b3, gamma3, beta3, tm=8, tn=128))
    assert out3.shape == (2, 8, H3)
    assert jnp.allclose(out3, ref3, atol=3e-2, rtol=3e-2), "mismatch (tiled path)"

    print("KERNEL_OK")
</pallas_src>

<mosaic_0001>
module attributes {stable_mosaic.version = 11 : i64} {
  func.func @k(%arg0: i32, %arg1: memref<8x128xf32, #tpu.memory_space<vmem>>, %arg2: memref<8x128xf32, #tpu.memory_space<vmem>>, %arg3: memref<8x128xf32, #tpu.memory_space<vmem>>) attributes {dimension_semantics = [#tpu.dimension_semantics<arbitrary>], iteration_bounds = array<i64: 2>, scalar_prefetch = 0 : i64, scratch_operands = 0 : i64, tpu.core_type = #tpu.core_type<tc>, window_params = [{transform_indices = @transform_0, window_bounds = array<i64: 8, 128>}, {pipeline_mode = #tpu.pipeline_mode<synchronous>, transform_indices = @transform_1, window_bounds = array<i64: 8, 128>}, {transform_indices = @transform_2, window_bounds = array<i64: 8, 128>}]} {
    %c0 = arith.constant 0 : index
    %c0_0 = arith.constant 0 : index
    %0 = vector.load %arg1[%c0, %c0_0] : memref<8x128xf32, #tpu.memory_space<vmem>>, vector<8x128xf32>
    %c0_1 = arith.constant 0 : index
    %c0_2 = arith.constant 0 : index
    %1 = vector.load %arg2[%c0_1, %c0_2] : memref<8x128xf32, #tpu.memory_space<vmem>>, vector<8x128xf32>
    %2 = arith.addf %0, %1 : vector<8x128xf32>
    %c0_3 = arith.constant 0 : index
    %c0_4 = arith.constant 0 : index
    %3 = vector.load %arg3[%c0_3, %c0_4] : memref<8x128xf32, #tpu.memory_space<vmem>>, vector<8x128xf32>
    tpu.vector_store %arg3[%c0_3, %c0_4], %2 {strides = array<i32>} : memref<8x128xf32, #tpu.memory_space<vmem>>, vector<8x128xf32>,
    return
  }
  func.func @transform_0(%arg0: i32) -> (i32, i32) {
    %c0_i32 = arith.constant 0 : i32
    %c0_i32_0 = arith.constant 0 : i32
    return %arg0, %c0_i32 : i32, i32
  }
  func.func @transform_1(%arg0: i32) -> (i32, i32) {
    %c0_i32 = arith.constant 0 : i32
    %c0_i32_0 = arith.constant 0 : i32
    %c0_i32_1 = arith.constant 0 : i32
    return %c0_i32, %c0_i32_0 : i32, i32
  }
  func.func @transform_2(%arg0: i32) -> (i32, i32) {
    %c0_i32 = arith.constant 0 : i32
    %c0_i32_0 = arith.constant 0 : i32
    return %arg0, %c0_i32 : i32, i32
  }
}

module attributes {stable_mosaic.version = 11 : i64} {
  func.func @kernel(%arg0: i32, %arg1: i32, %arg2: memref<8x32xf32, #tpu.memory_space<vmem>>, %arg3: memref<32x32xf32, #tpu.memory_space<vmem>>, %arg4: memref<1x32xf32, #tpu.memory_space<vmem>>, %arg5: memref<1x32xf32, #tpu.memory_space<vmem>>, %arg6: memref<1x32xf32, #tpu.memory_space<vmem>>, %arg7: memref<8x32xf32, #tpu.memory_space<vmem>>) attributes {dimension_semantics = [#tpu.dimension_semantics<parallel>, #tpu.dimension_semantics<arbitrary>], iteration_bounds = array<i64: 2, 1>, scalar_prefetch = 0 : i64, scratch_operands = 0 : i64, tpu.core_type = #tpu.core_type<tc>, window_params = [{transform_indices = @transform_0, window_bounds = array<i64: 8, 32>}, {transform_indices = @transform_1, window_bounds = array<i64: 32, 32>}, {transform_indices = @transform_2, window_bounds = array<i64: 1, 32>}, {pipeline_mode = #tpu.pipeline_mode<synchronous>, transform_indices = @transform_3, window_bounds = array<i64: 1, 32>}, {pipeline_mode = #tpu.pipeline_mode<synchronous>, transform_indices = @transform_4, window_bounds = array<i64: 1, 32>}, {transform_indices = @transform_5, window_bounds = array<i64: 8, 32>}]} {
    %c0 = arith.constant 0 : index
    %c0_0 = arith.constant 0 : index
    %0 = vector.load %arg2[%c0, %c0_0] : memref<8x32xf32, #tpu.memory_space<vmem>>, vector<8x32xf32>
    %cst = arith.constant dense<0.000000e+00> : vector<8xf32>
    %1 = vector.multi_reduction <add>, %0, %cst [1] : vector<8x32xf32> to vector<8xf32>
    %2 = vector.shape_cast %1 : vector<8xf32> to vector<8x1xf32>
    %cst_1 = arith.constant 3.200000e+01 : f32
    %3 = vector.broadcast %cst_1 : f32 to vector<8x1xf32>
    %4 = arith.divf %2, %3 : vector<8x1xf32>
    %5 = vector.broadcast %4 : vector<8x1xf32> to vector<8x32xf32>
    %6 = arith.subf %0, %5 : vector<8x32xf32>
    %7 = arith.mulf %6, %6 : vector<8x32xf32>
    %cst_2 = arith.constant dense<0.000000e+00> : vector<8xf32>
    %8 = vector.multi_reduction <add>, %7, %cst_2 [1] : vector<8x32xf32> to vector<8xf32>
    %9 = vector.shape_cast %8 : vector<8xf32> to vector<8x1xf32>
    %cst_3 = arith.constant 3.200000e+01 : f32
    %10 = vector.broadcast %cst_3 : f32 to vector<8x1xf32>
    %11 = arith.divf %9, %10 : vector<8x1xf32>
    %c0_4 = arith.constant 0 : index
    %c0_5 = arith.constant 0 : index
    %12 = vector.load %arg5[%c0_4, %c0_5] : memref<1x32xf32, #tpu.memory_space<vmem>>, vector<1x32xf32>
    %cst_6 = arith.constant 9.99999996E-13 : f32
    %13 = vector.broadcast %cst_6 : f32 to vector<8x1xf32>
    %14 = arith.addf %11, %13 : vector<8x1xf32>
    %15 = math.rsqrt %14 : vector<8x1xf32>
    %16 = vector.broadcast %15 : vector<8x1xf32> to vector<8x32xf32>
    %17 = arith.mulf %6, %16 : vector<8x32xf32>
    %18 = vector.broadcast %12 : vector<1x32xf32> to vector<8x32xf32>
    %19 = arith.mulf %18, %17 : vector<8x32xf32>
    %c0_7 = arith.constant 0 : index
    %c0_8 = arith.constant 0 : index
    %20 = vector.load %arg6[%c0_7, %c0_8] : memref<1x32xf32, #tpu.memory_space<vmem>>, vector<1x32xf32>
    %21 = vector.broadcast %20 : vector<1x32xf32> to vector<8x32xf32>
    %22 = arith.addf %19, %21 : vector<8x32xf32>
    %c0_9 = arith.constant 0 : index
    %c0_10 = arith.constant 0 : index
    %23 = vector.load %arg3[%c0_9, %c0_10] : memref<32x32xf32, #tpu.memory_space<vmem>>, vector<32x32xf32>
    %cst_11 = arith.constant dense<0.000000e+00> : vector<8x32xf32>
    %24 = tpu.matmul %22, %23, %cst_11 {dimension_numbers = #tpu.dot_dimension_numbers<[1], [0], [0], [1], [0, 0, 1, 1], [], []>} : vector<8x32xf32>, vector<32x32xf32>, vector<8x32xf32> -> vector<8x32xf32>
    %c0_12 = arith.constant 0 : index
    %c0_13 = arith.constant 0 : index
    %25 = vector.load %arg4[%c0_12, %c0_13] : memref<1x32xf32, #tpu.memory_space<vmem>>, vector<1x32xf32>
    %26 = vector.broadcast %25 : vector<1x32xf32> to vector<8x32xf32>
    %27 = arith.addf %24, %26 : vector<8x32xf32>
    %c0_14 = arith.constant 0 : index
    %c0_15 = arith.constant 0 : index
    %28 = vector.load %arg2[%c0_14, %c0_15] : memref<8x32xf32, #tpu.memory_space<vmem>>, vector<8x32xf32>
    %29 = arith.addf %28, %27 : vector<8x32xf32>
    %c0_16 = arith.constant 0 : index
    %c0_17 = arith.constant 0 : index
    %30 = vector.load %arg7[%c0_16, %c0_17] : memref<8x32xf32, #tpu.memory_space<vmem>>, vector<8x32xf32>
    tpu.vector_store %arg7[%c0_16, %c0_17], %29 {strides = array<i32>} : memref<8x32xf32, #tpu.memory_space<vmem>>, vector<8x32xf32>,
    return
  }
  func.func @transform_0(%arg0: i32, %arg1: i32) -> (i32, i32) {
    %c0_i32 = arith.constant 0 : i32
    %c0_i32_0 = arith.constant 0 : i32
    return %arg0, %c0_i32 : i32, i32
  }
  func.func @transform_1(%arg0: i32, %arg1: i32) -> (i32, i32) {
    %c0_i32 = arith.constant 0 : i32
    %c0_i32_0 = arith.constant 0 : i32
    return %c0_i32, %arg1 : i32, i32
  }
  func.func @transform_2(%arg0: i32, %arg1: i32) -> (i32, i32) {
    %c0_i32 = arith.constant 0 : i32
    %c0_i32_0 = arith.constant 0 : i32
    return %c0_i32, %arg1 : i32, i32
  }
  func.func @transform_3(%arg0: i32, %arg1: i32) -> (i32, i32) {
    %c0_i32 = arith.constant 0 : i32
    %c0_i32_0 = arith.constant 0 : i32
    %c0_i32_1 = arith.constant 0 : i32
    return %c0_i32, %c0_i32_0 : i32, i32
  }
  func.func @transform_4(%arg0: i32, %arg1: i32) -> (i32, i32) {
    %c0_i32 = arith.constant 0 : i32
    %c0_i32_0 = arith.constant 0 : i32
    %c0_i32_1 = arith.constant 0 : i32
    return %c0_i32, %c0_i32_0 : i32, i32
  }
  func.func @transform_5(%arg0: i32, %arg1: i32) -> (i32, i32) {
    %c0_i32 = arith.constant 0 : i32
    return %arg0, %arg1 : i32, i32
  }
}

</mosaic_0001>

<bundles_post_ra>
// kernel: tpu_custom_call.1
= control target key start
LH: loop header
LB: loop body
LE: loop exit
PB: predicated region body
PF: predicated region fallthrough
CT: control target
= control target key end

     0   :  { %7 = vsyncpa [#allocation3], 0  ;;  %s649_s0 = inlined_call_operand.hbm [shape: f32[16,128], index: 0, kind: input, shape index: {}]   ;;  %s650_s1 = inlined_call_operand.hbm [shape: f32[8,128], index: 1, kind: input, shape index: {}]   ;;  %s651_s2 = inlined_call_operand.hbm [shape: f32[16,128], index: 2, kind: output, shape index: {}]  }
   0x1   :  { %9 = vsyncpa [#allocation3 + $0x1], 0 }
   0x2   :  { %10 = vsyncpa [#allocation6], 0 }
   0x3   :  { %11 = vsyncpa [#allocation4], 0 }
   0x4   :  { %13 = vsyncpa [#allocation4 + $0x1], 0  ;;  %s483_s9 = smov 0   ;;  %s485_s10 = smov 0  }
   0x5   :  { %s487_s11 = smov 0   ;;  %s489_s12 = smov 0  }
   0x6 LB: > { %s504_s13 = sadd.s32 4294967295, %s463_s12   ;;  %s270_s14 = sadd.s32 4294967294, %s463_s12   ;;  %s463_s12 = sphi %s489_s12, %s674_s12   ;;  %s459_s11 = sphi %s487_s11, %s673_s11   ;;  %s455_s10 = sphi %s485_s10, %s672_s10   ;;  %s451_s9 = sphi %s483_s9, %s671_s9  }
   0x7   : > { %p39_p0 = scmp.ne.s32.totalorder %s455_s10, %s451_s9  ;;  %p652_p1 = scmp.eq.s32.totalorder %s504_s13, 0 }
   0x8   : > { %p90_p3 = scmp.eq.s32.totalorder %s270_s14, 1  ;;  %p271_p5 = scmp.ge.s32.totalorder %s463_s12, 1 }
   0x9   : > { %p513_p4 = por %p652_p1, %p39_p0  ;;  %p97_p7 = scmp.lt.s32.totalorder %s463_s12, 3 }
   0xa   : > { %p518_p6 = por %p90_p3, %p39_p0  ;;  %s465_s18 = smov [#allocation5]  }
   0xb   : > { %s656_s15 = scalar_select %p513_p4, 1, 0 }
   0xc   : > { %s657_s16 = scalar_select %p518_p6, 1, 0 }
   0xd   : > { %p523_p8 = pnand %p271_p5, %p97_p7  ;;  %s110_s19 = sshll.u32 %s465_s18, 4  ;;  %s111_s19 = int_to_ptr.vmem [resolvable:$true] %s110_s19 }
   0xe   : > { %s531_s20 = sadd.s32 1, %s463_s12   ;;  %s26_s24 = sadd.s32 1, %s459_s11 }
   0xf   : > { %s658_s17 = scalar_select %p523_p8, 1, 0 }
  0x10   : > { %p292_p10 = pneg %p523_p8  ;;  %s23_s22 = ssub.s32 %s463_s12, %s531_s20 }
  0x11   : > { %p541_p12 = scmp.eq.s32.totalorder %s23_s22, 0  ;;  %p33_p13 = scmp.ne.s32.totalorder %s459_s11, %s455_s10 }
  0x12   : > { %p535_p11 = pnand %p292_p10, %p652_p1  ;;  %s352_s25 = scalar_lea.vmem %s111_s19, 128 }
  0x13   : > { %p353_p3 = scmp.ne.s32.totalorder %s111_s19, %s352_s25  ;;  %p360_p9 = scmp.lt.s32.totalorder %s111_s19, %s111_s19 }
  0x14   : > { %p343_p0 = pneg %p535_p11  ;;  %p361_p2 = scmp.lt.s32.totalorder %s352_s25, %s352_s25 }
  0x16   : > { %p355_p5 = pnand %p353_p3, %p343_p0  ;;  %p362_p10 = por %p361_p2, %p360_p9 }
  0x18   : > { %p356_p7 = pneg %p355_p5 }
  0x1a   : > { %p363_p1 = pnand %p362_p10, %p356_p7 }
  0x1c   : > { %366 = shalt.err (!%p363_p1)
}
  0x1d   : > { %295 = dma.hbm_to_vmem [thread:$0]  (!%p535_p11), %s650_s1, 128, %s111_s19, [#allocation6]  }
  0x1e   : > { %s558_s28 = scalar_select %p541_p12, %s459_s11, %s26_s24  }
  0x1f   : > { %p34_p1 = scmp.eq.s32.totalorder %s463_s12, 0  ;;  %p661_p2 = scmp.eq.s32.totalorder %s504_s13, 1 }
  0x20   : > { %p305_p0 = scmp.lt.s32.totalorder %s463_s12, 2  ;;  %s121_s30 = sand.u32 1, %s459_s11  }
  0x21   : > { %p566_p9 = por %p661_p2, %p33_p13  ;;  %p35_p3 = por %p34_p1, %p33_p13 }
  0x22   : > { %s274_s3 = sshll.u32 %s121_s30, 3  ;;  %s275_s4 = sshll.u32 %s463_s12, 7 }
  0x23   : > { %s662_s29 = scalar_select %p566_p9, 1, 0 }
  0x24   : > { %s579_s7 = scalar_lea.hbm %s649_s0, %s275_s4  ;;  %s125_s8 = scalar_lea.vmem [#allocation2], %s274_s3 }
  0x25   : > { %s132_s14 = sshll.u32 %s125_s8, 4  ;;  %p581_p11 = pnand %p305_p0, %p35_p3  ;;  %s133_s14 = int_to_ptr.vmem [resolvable:$true] %s132_s14 }
  0x26   : > { %s122_s19 = scalar_lea.sflag [#allocation3], %s121_s30  ;;  %s367_s21 = scalar_lea.hbm %s579_s7, 128 }
  0x27   : > { %p368_p12 = scmp.ne.s32.totalorder %s579_s7, %s367_s21  ;;  %p369_p13 = pneg %p581_p11 }
  0x28   : > { %s372_s24 = scalar_lea.hbm %s649_s0, 256  ;;  %p373_p10 = scmp.lt.s32.totalorder %s579_s7, %s649_s0 }
  0x29   : > { %p370_p5 = pnand %p369_p13, %p368_p12  ;;  %p374_p1 = scmp.lt.s32.totalorder %s372_s24, %s367_s21 }
  0x2b   : > { %p371_p7 = pneg %p370_p5  ;;  %p375_p2 = por %p374_p1, %p373_p10 }
  0x2d   : > { %p376_p0 = pnand %p375_p2, %p371_p7 }
  0x2f   : > { %379 = shalt.err (!%p376_p0)
}
  0x30   : > { %s380_s27 = scalar_lea.vmem %s133_s14, 128  ;;  %s466_s30 = smov [#allocation2]  }
  0x31   : > { %p381_p3 = scmp.ne.s32.totalorder %s133_s14, %s380_s27  ;;  %s385_s3 = sshll.u32 %s466_s30, 4  ;;  %s386_s3 = int_to_ptr.vmem [resolvable:$false] %s385_s3 }
  0x32   : > { %s387_s4 = scalar_lea.vmem %s386_s3, 256  ;;  %p388_p12 = scmp.lt.s32.totalorder %s133_s14, %s386_s3 }
  0x33   : > { %p383_p6 = pnand %p381_p3, %p369_p13  ;;  %p389_p5 = scmp.lt.s32.totalorder %s387_s4, %s380_s27 }
  0x35   : > { %p384_p9 = pneg %p383_p6  ;;  %p390_p4 = por %p389_p5, %p388_p12 }
  0x37   : > { %p391_p8 = pnand %p390_p4, %p384_p9 }
  0x39   : > { %394 = shalt.err (!%p391_p8)
}
  0x3a   : > { %299 = dma.hbm_to_vmem [thread:$0]  (!%p581_p11), %s579_s7, 128, %s133_s14, %s122_s19  }
  0x3b   : > { %p664_p7 = scmp.ne.s32.totalorder %s658_s17, 0 }
  0x3c   : > { %s602_s5 = sand.u32 (!%p664_p7), 1, %s455_s10   ;;  %p665_p6 = scmp.ne.s32.totalorder (!%p664_p7), %s656_s15, 0 }
  0x3d   : > { %141 = sbr.rel (%p664_p7) target bundleno = 95 (0x5f), region = 28  ;;  %s277_s6 = sshll.u32 (!%p664_p7), %s602_s5, 3 }
  0x3e   : > { %s144_s8 = scalar_lea.sflag (!%p664_p7), [#allocation3], %s602_s5  ;;  %s147_s21 = scalar_lea.vmem (!%p664_p7), [#allocation2], %s277_s6 }
  0x42   : > { %438 = dma.done.wait (%p665_p6), %s144_s8, 128  }
  0x43   : > { %440 = vsyncadd (%p665_p6), %s144_s8, 4294967168  ;;  %p666_p4 = scmp.eq.s32.totalorder %s504_s13, 0 }
  0x45   : > { %442 = dma.done.wait (%p666_p4), [#allocation6], 128   ;;  %p667_p8 = pmov %p666_p4 }
  0x46   : > { %s171_s17 = scalar_lea.vmem [#allocation7], %s277_s6  ;;  %s281_s14 = sshll.u32 %s504_s13, 7  ;;  %v172_v0 = vld [vmem:[%s147_s21] sm:$0xff]  ;;  %v173_v1 = vld [vmem:[#allocation5] sm:$0xff] }
  0x47   : > { %444 = vsyncadd (%p667_p8), [#allocation6], 4294967168  ;;  %s190_s7 = sshll.u32 %s171_s17, 4  ;;  %v174_v2 = vadd.f32 %v173_v1, %v172_v0  ;;  %s188_s15 = scalar_lea.hbm %s651_s2, %s281_s14  ;;  %s191_s7 = int_to_ptr.vmem [resolvable:$true] %s190_s7 }
  0x48   : > { %s177_s22 = scalar_lea.sflag [#allocation4], %s602_s5  ;;  %s395_s23 = scalar_lea.vmem %s191_s7, 128 }
  0x49   : > { %175 = vst [vmem:[%s171_s17] sm:$0xff] %v174_v2  ;;  %p396_p9 = scmp.ne.s32.totalorder %s191_s7, %s395_s23  ;;  %p668_p11 = scmp.ne.s32.totalorder %s662_s29, 0 }
  0x4a   : > { %s467_s24 = smov [#allocation7]  }
  0x4b   : > { %p397_p13 = pnand %p396_p9, %p668_p11  ;;  %s399_s25 = sshll.u32 %s467_s24, 4  ;;  %s400_s25 = int_to_ptr.vmem [resolvable:$false] %s399_s25 }
  0x4c   : > { %s401_s26 = scalar_lea.vmem %s400_s25, 256  ;;  %p402_p1 = scmp.lt.s32.totalorder %s191_s7, %s400_s25 }
  0x4d   : > { %p398_p10 = pneg %p397_p13  ;;  %p403_p2 = scmp.lt.s32.totalorder %s401_s26, %s395_s23 }
  0x4f   : > { %p404_p0 = por %p403_p2, %p402_p1 }
  0x51   : > { %p405_p3 = pnand %p404_p0, %p398_p10 }
  0x53   : > { %408 = shalt.err (!%p405_p3)
}
  0x54   : > { %s409_s13 = scalar_lea.hbm %s188_s15, 128  ;;  %s413_s3 = scalar_lea.hbm %s651_s2, 256 }
  0x55   : > { %p410_p12 = scmp.ne.s32.totalorder %s188_s15, %s409_s13  ;;  %p414_p6 = scmp.lt.s32.totalorder %s188_s15, %s651_s2 }
  0x56   : > { %p415_p4 = scmp.lt.s32.totalorder %s413_s3, %s409_s13 }
  0x57   : > { %p411_p5 = pnand %p410_p12, %p668_p11 }
  0x58   : > { %p416_p8 = por %p415_p4, %p414_p6 }
  0x59   : > { %p412_p7 = pneg %p411_p5 }
  0x5b   : > { %p417_p9 = pnand %p416_p8, %p412_p7 }
  0x5d   : > { %420 = shalt.err (!%p417_p9)
}
  0x5e   : > { %290 = dma.vmem_to_hbm [thread:$0]  (%p668_p11), %s191_s7, 128, %s188_s15, %s177_s22  }
  0x5f PF: > { %s202_s6 = sand.u32 1, %s451_s9   ;;  %p669_p13 = scmp.ne.s32.totalorder %s657_s16, 0 }
  0x60   : > { %p670_p10 = scmp.ge.s32.totalorder %s463_s12, 2  ;;  %s203_s8 = scalar_lea.sflag [#allocation4], %s202_s6 }
  0x62   : > { %p301_p1 = pnand %p670_p10, %p669_p13 }
  0x64   : > { %p302_p2 = pneg %p301_p1 }
  0x66   : > { %446 = dma.done.wait (%p302_p2), %s203_s8, 128  }
  0x67   : > { %448 = vsyncadd (%p302_p2), %s203_s8, 4294967168  ;;  %p16_p0 = scmp.ge.s32.totalorder %s531_s20, 4   ;;  %s671_s9 = smov %s455_s10 }
  0x68   : > { %s672_s10 = smov %s459_s11  ;;  %s673_s11 = smov %s558_s28 }
  0x69   : > { %s674_s12 = smov %s531_s20  ;;  %18 = sbr.rel (!%p16_p0) target bundleno = 6 (0x6), region = 77 }
  0x6e   :  { %208 = vsyncpa [#allocation3], 1 }
  0x6f   :  { %210 = vsyncpa [#allocation3 + $0x1], 1 }
  0x70   :  { %211 = vsyncpa [#allocation6], 1 }
  0x71   :  { %212 = vsyncpa [#allocation4], 1 }
  0x72   :  { %214 = vsyncpa [#allocation4 + $0x1], 1 }

// kernel: tpu_custom_call.1
= control target key start
LH: loop header
LB: loop body
LE: loop exit
PB: predicated region body
PF: predicated region fallthrough
CT: control target
= control target key end

     0   :  { %10 = vsyncpa [#allocation3], 0  ;;  %s932_s0 = inlined_call_operand.hbm [shape: f32[16,32], index: 0, kind: input, shape index: {}, may-alias: {0,5}]   ;;  %s933_s1 = inlined_call_operand.vmem [shape: f32[32,32], index: 1, kind: input, shape index: {}]   ;;  %s934_s2 = inlined_call_operand.vmem [shape: f32[1,32], index: 2, kind: input, shape index: {}]   ;;  %s935_s3 = inlined_call_operand.vmem [shape: f32[1,32], index: 3, kind: input, shape index: {}]   ;;  %s936_s4 = inlined_call_operand.vmem [shape: f32[1,32], index: 4, kind: input, shape index: {}]   ;;  %s937_s5 = inlined_call_operand.hbm [shape: f32[16,32], index: 5, kind: output, shape index: {}, may-alias: {0,5}]  }
   0x1   :  { %12 = vsyncpa [#allocation3 + $0x1], 0 }
   0x2   :  { %13 = vsyncpa [#allocation4], 0 }
   0x3   :  { %15 = vsyncpa [#allocation4 + $0x1], 0  ;;  %s769_s18 = smov 0   ;;  %s771_s19 = smov 0  }
   0x4   :  { %s773_s20 = smov 0   ;;  %s775_s21 = smov 0  }
   0x5   :  { %s777_s22 = smov 0   ;;  %s779_s23 = smov 0  }
   0x6 LB: > { %s524_s24 = sadd.s32 4294967295, %s733_s23   ;;  %s525_s25 = sadd.s32 4294967294, %s733_s23   ;;  %s733_s23 = sphi %s779_s23, %s21_s23   ;;  %s729_s22 = sphi %s777_s22, %s949_s22   ;;  %s725_s21 = sphi %s775_s21, %s948_s21   ;;  %s721_s20 = sphi %s773_s20, %s947_s20   ;;  %s717_s19 = sphi %s771_s19, %s946_s19   ;;  %s713_s18 = sphi %s769_s18, %s945_s18  }
   0x7   : > { %s33_s26 = sadd.s32 1, %s729_s22  ;;  %s40_s27 = sadd.s32 1, %s721_s20 }
   0x8   : > { %p35_p0 = scmp.ge.s32.totalorder %s33_s26, 2  ;;  %p47_p1 = scmp.ne.s32.totalorder %s721_s20, %s717_s19 }
   0x9   : > { %p48_p2 = scmp.eq.s32.totalorder %s733_s23, 0  ;;  %p53_p3 = scmp.ne.s32.totalorder %s717_s19, %s713_s18 }
   0xa   : > { %s951_s26 = smov (%p35_p0, %s33_s26), 0  ;;  %p54_p5 = scmp.eq.s32.totalorder %s524_s24, 0 }
   0xb   : > { %p810_p4 = por %p48_p2, %p47_p1  ;;  %s37_s29 = ssub.s32 %s729_s22, %s951_s26 }
   0xc   : > { %p173_p6 = scmp.eq.s32.totalorder %s524_s24, 1  ;;  %p38_p7 = scmp.eq.s32.totalorder %s37_s29, 0 }
   0xd   : > { %p816_p8 = por %p54_p5, %p53_p3  ;;  %p179_p10 = scmp.eq.s32.totalorder %s525_s25, 1 }
   0xe   : > { %p820_p9 = por %p173_p6, %p47_p1  ;;  %p571_p13 = scmp.lt.s32.totalorder %s733_s23, 2 }
   0xf   : > { %s825_s7 = scalar_select %p38_p7, %s721_s20, %s40_s27  }
  0x10   : > { %p827_p11 = por %p179_p10, %p53_p3  ;;  %s218_s9 = sand.u32 1, %s721_s20  }
  0x11   : > { %s530_s10 = sshll.u32 %s218_s9, 3  ;;  %s531_s11 = sshll.u32 %s729_s22, 7 }
  0x12   : > { %s941_s8 = scalar_select %p827_p11, 1, 0 }
  0x13   : > { %s227_s14 = scalar_lea.hbm %s932_s0, %s531_s11  ;;  %s222_s15 = scalar_lea.vmem [#allocation2], %s530_s10 }
  0x14   : > { %s229_s16 = sshll.u32 %s222_s15, 4  ;;  %p840_p0 = pnand %p571_p13, %p810_p4  ;;  %s230_s16 = int_to_ptr.vmem [resolvable:$true] %s229_s16 }
  0x15   : > { %p532_p1 = scmp.ge.s32.totalorder %s733_s23, 1  ;;  %p234_p2 = scmp.lt.s32.totalorder %s733_s23, 3 }
  0x16   : > { %s219_s24 = scalar_lea.sflag [#allocation3], %s218_s9  ;;  %p627_p3 = pneg %p840_p0 }
  0x17   : > { %s638_s25 = scalar_lea.vmem %s230_s16, 128  ;;  %s735_s27 = smov [#allocation2]  }
  0x18   : > { %p639_p5 = scmp.ne.s32.totalorder %s230_s16, %s638_s25  ;;  %s643_s29 = sshll.u32 %s735_s27, 4  ;;  %s644_s29 = int_to_ptr.vmem [resolvable:$false] %s643_s29 }
  0x19   : > { %s645_s10 = scalar_lea.vmem %s644_s29, 256  ;;  %p646_p10 = scmp.lt.s32.totalorder %s230_s16, %s644_s29 }
  0x1a   : > { %p641_p6 = pnand %p639_p5, %p627_p3  ;;  %p647_p12 = scmp.lt.s32.totalorder %s645_s10, %s638_s25 }
  0x1c   : > { %p642_p7 = pneg %p641_p6  ;;  %p648_p4 = por %p647_p12, %p646_p10 }
  0x1e   : > { %p649_p13 = pnand %p648_p4, %p642_p7 }
  0x20   : > { %652 = shalt.err (!%p649_p13)
}
  0x21   : > { %566 = dma.hbm_to_vmem [thread:$0]  (!%p840_p0), %s227_s14, 128, %s230_s16, %s219_s24  }
  0x22   : > { %p235_p11 = pnand %p532_p1, %p234_p2 }
  0x23   : > { %s855_s28 = sand.u32 (!%p235_p11), 1, %s717_s19  }
  0x24   : > { %238 = sbr.rel (%p235_p11) target bundleno = 561 (0x231), region = 40  ;;  %s533_s9 = sshll.u32 (!%p235_p11), %s855_s28, 3 }
  0x25   : > { %s241_s11 = scalar_lea.sflag (!%p235_p11), [#allocation3], %s855_s28  ;;  %s244_s12 = scalar_lea.vmem (!%p235_p11), [#allocation2], %s533_s9 }
  0x29   : > { %704 = dma.done.wait (%p816_p8), %s241_s11, 128  }
  0x2a   : > { %706 = vsyncadd (%p816_p8), %s241_s11, 4294967168  ;;  %vm286_vm0 = vcmask 261120   ;;  %v285_v0 = vld [vmem:[%s244_s12] sm:$0xff]  ;;  %v320_v7 = vld [vmem:[%s933_s1 + $0x18] sm:$0xff]  ;;  %v736_v8 = vmov 0.0   ;;  %vm737_vm1 = vmmov 0  }
  0x2b   : > { %v287_v1 = vsel %vm286_vm0, %v285_v0, 0.0  ;;  %548 = vmatprep.subr.mxu0 %v736_v8  ;;  %v319_v9 = vld [vmem:[%s933_s1 + $0x10] sm:$0xff]  ;;  %556 = vmatprep.mubr.msk.f32.mxu0 %vm737_vm1, %v736_v8  ;;  %v318_v10 = vld [vmem:[%s933_s1 + $0x8] sm:$0xff]  ;;  %v317_v11 = vld [vmem:[%s933_s1] sm:$0xff]  ;;  %s540_s14 = sshll.u32 %s725_s21, 7  ;;  %s277_s30 = scalar_lea.vmem [#allocation5], %s533_s9 }
  0x2c   : > { %288 = vadd.xlane.f32.xlu0 %v287_v1  ;;  %549 = vmatpush3.msra.mxu0 %v320_v7  ;;  %v535_v16 = vld [vmem:[%s935_s3] ss:$0 sm:$0xff]  ;;  %s418_s15 = sshll.u32 %s277_s30, 4  ;;  %s416_s24 = scalar_lea.hbm %s937_s5, %s540_s14  ;;  %s419_s15 = int_to_ptr.vmem [resolvable:$true] %s418_s15 }
  0x2d   : > { %550 = vmatprep.subr.mxu0 %v736_v8  ;;  %v536_v18 = vld [vmem:[%s936_s4] ss:$0 sm:$0xff]  ;;  %s404_s25 = scalar_lea.sflag [#allocation4], %s855_s28  ;;  %s653_s27 = scalar_lea.vmem %s419_s15, 128 }
  0x2e   : > { %551 = vmatpush3.msra.mxu0 %v319_v9  ;;  %v537_v21 = vld [vmem:[%s934_s2] ss:$0 sm:$0xff]  ;;  %p654_p8 = scmp.ne.s32.totalorder %s419_s15, %s653_s27  ;;  %s738_s21 = smov [#allocation5]  }
  0x2f   : > { %552 = vmatprep.subr.mxu0 %v736_v8  ;;  %s657_s29 = sshll.u32 %s738_s21, 4  ;;  %s658_s29 = int_to_ptr.vmem [resolvable:$false] %s657_s29 }
  0x30   : > { %553 = vmatpush3.msra.mxu0 %v318_v10  ;;  %p655_p11 = pnand %p654_p8, %p820_p9  ;;  %s659_s9 = scalar_lea.vmem %s658_s29, 256 }
  0x31   : > { %554 = vmatprep.subr.mxu0 %v736_v8  ;;  %p660_p0 = scmp.lt.s32.totalorder %s419_s15, %s658_s29  ;;  %p661_p1 = scmp.lt.s32.totalorder %s659_s9, %s653_s27 }
  0x32   : > { %555 = vmatpush3.msra.mxu0 %v317_v11  ;;  %p656_p12 = pneg %p655_p11 }
  0x33   : > { %p662_p2 = por %p661_p1, %p660_p0 }
  0x35   : > { %p663_p3 = pnand %p662_p2, %p656_p12 }
  0xb5   : > { %v289_v2 = vpop.xlane.xlu0 %288 }
  0xb6   : > { %v291_v3 = vmul.f32 0.03125, %v289_v2 }
  0xb8   : > { %v292_v4 = vsub.f32 %v285_v0, %v291_v3 }
  0xba   : > { %v293_v5 = vmul.f32 %v292_v4, %v292_v4 }
  0xbc   : > { %v294_v6 = vsel %vm286_vm0, %v293_v5, 0.0 }
  0xbd   : > { %295 = vadd.xlane.f32.xlu0 %v294_v6 }
 0x146   : > { %v296_v12 = vpop.xlane.xlu0 %295 }
 0x147   : > { %v297_v13 = vmul.f32 0.03125, %v296_v12 }
 0x149   : > { %v299_v14 = vadd.f32 1e-12, %v297_v13 }
 0x14b   : > { %623 = vrsqrt.f32 %v299_v14 }
 0x158   : > { %v624_v15 = vpop.eup %623 }
 0x159   : > { %v301_v17 = vmul.f32 %v624_v15, %v292_v4 }
 0x15b   : > { %v308_v19 = vmul.f32 %v535_v16, %v301_v17 }
 0x15d   : > { %v316_v20 = vadd.f32 %v536_v18, %v308_v19 }
 0x15f   : > { %557 = vmatmul.mubr.msk.f32.vlgmr.msra.gmra.mxu0 %vm286_vm0, %v316_v20 }
 0x21f   : > { %v397_v22 = vpop.f32.mrf.mxu0 }
 0x220   : > { %v398_v23 = vadd.f32 %v537_v21, %v397_v22 }
 0x221   : > { %v558_v24 = vpop.f32.mrf.mxu0 }
 0x222   : > { %v401_v25 = vadd.f32 %v398_v23, %v285_v0 }
 0x224   : > { %402 = vst.msk [vmem:[%s277_s30] sm:$0xff] %vm286_vm0, %v401_v25 }
 0x225   : > { %666 = shalt.err (!%p663_p3)
}
 0x226   : > { %s667_s10 = scalar_lea.hbm %s416_s24, 128  ;;  %s671_s12 = scalar_lea.hbm %s937_s5, 256 }
 0x227   : > { %p668_p5 = scmp.ne.s32.totalorder %s416_s24, %s667_s10  ;;  %p672_p10 = scmp.lt.s32.totalorder %s416_s24, %s937_s5 }
 0x228   : > { %p673_p4 = scmp.lt.s32.totalorder %s671_s12, %s667_s10 }
 0x229   : > { %p669_p6 = pnand %p668_p5, %p820_p9 }
 0x22a   : > { %p674_p13 = por %p673_p4, %p672_p10 }
 0x22b   : > { %p670_p7 = pneg %p669_p6 }
 0x22d   : > { %p675_p8 = pnand %p674_p13, %p670_p7 }
 0x22f   : > { %678 = shalt.err (!%p675_p8)
}
 0x230   : > { %561 = dma.vmem_to_hbm [thread:$0]  (%p820_p9), %s419_s15, 128, %s416_s24, %s404_s25  }
 0x231 PF: > { %s430_s30 = sand.u32 1, %s713_s18   ;;  %p943_p11 = scmp.ne.s32.totalorder %s941_s8, 0 }
 0x232   : > { %p944_p12 = scmp.ge.s32.totalorder %s733_s23, 2  ;;  %s431_s16 = scalar_lea.sflag [#allocation4], %s430_s30 }
 0x234   : > { %p568_p0 = pnand %p944_p12, %p943_p11 }
 0x236   : > { %p569_p1 = pneg %p568_p0 }
 0x238   : > { %708 = dma.done.wait (%p569_p1), %s431_s16, 128  }
 0x239   : > { %710 = vsyncadd (%p569_p1), %s431_s16, 4294967168  ;;  %s21_s23 = sadd.s32 1, %s733_s23   ;;  %s945_s18 = smov %s717_s19 }
 0x23a   : > { %p18_p2 = scmp.ge.s32.totalorder %s21_s23, 4   ;;  %s946_s19 = smov %s721_s20 }
 0x23b   : > { %s947_s20 = smov %s825_s7  ;;  %s948_s21 = smov %s729_s22 }
 0x23c   : > { %s949_s22 = smov %s951_s26  ;;  %20 = sbr.rel (!%p18_p2) target bundleno = 6 (0x6), region = 91 }
 0x241   :  { %436 = vsyncpa [#allocation3], 1 }
 0x242   :  { %438 = vsyncpa [#allocation3 + $0x1], 1 }
 0x243   :  { %439 = vsyncpa [#allocation4], 1 }
 0x244   :  { %441 = vsyncpa [#allocation4 + $0x1], 1 }

</bundles_post_ra>
